<compile_context>
chip_gen: v7x
topology: tpu7x:2x2x1
jax: 0.10.0
libtpu: 0.0.40
codegen_flags: <defaults>
</compile_context>

<pallas_src>
import jax
import jax.numpy as jnp
from jax.experimental import pallas as pl
from jax.experimental.pallas import tpu as pltpu

EPS = 1e-5
CG = 8  # channels per grid step (sublane-aligned)


def _bn_kernel(x_ref, g_ref, b_ref, o_ref):
    # x_ref: (CG, L) channel-major slab; g_ref/b_ref: (CG, 1)
    x = x_ref[...].astype(jnp.float32)
    inv_l = 1.0 / x.shape[1]
    # single-pass per-channel statistics (biased variance, PyTorch training mode)
    s = jnp.sum(x, axis=1, keepdims=True)
    ss = jnp.sum(x * x, axis=1, keepdims=True)
    mean = s * inv_l
    var = ss * inv_l - mean * mean
    # fold normalization into one per-channel FMA
    scale = g_ref[...].astype(jnp.float32) * jax.lax.rsqrt(var + EPS)
    bias = b_ref[...].astype(jnp.float32) - mean * scale
    o_ref[...] = (x * scale + bias).astype(o_ref.dtype)


def batchnorm2d_pallas(x_nchw, gamma, beta):
    """x_nchw: [N, C, H, W]; gamma, beta: [C]. Returns [N, C, H, W]."""
    N, C, H, W = x_nchw.shape
    L = N * H * W

    # channel-major 2D layout (C, N*H*W); for N==1 this is a free reshape.
    if N == 1:
        x2d = x_nchw.reshape(C, L)
    else:
        x2d = jnp.transpose(x_nchw, (1, 0, 2, 3)).reshape(C, L)

    # pad channels to a sublane multiple (no-op for C=24)
    Cp = ((C + CG - 1) // CG) * CG
    if Cp != C:
        x2d = jnp.pad(x2d, ((0, Cp - C), (0, 0)))
        gamma_p = jnp.pad(gamma.astype(jnp.float32), (0, Cp - C), constant_values=1.0)
        beta_p = jnp.pad(beta.astype(jnp.float32), (0, Cp - C))
    else:
        gamma_p = gamma.astype(jnp.float32)
        beta_p = beta.astype(jnp.float32)

    g2d = gamma_p.reshape(Cp, 1)
    b2d = beta_p.reshape(Cp, 1)

    out2d = pl.pallas_call(
        _bn_kernel,
        out_shape=jax.ShapeDtypeStruct((Cp, L), x_nchw.dtype),
        grid=(Cp // CG,),
        in_specs=[
            pl.BlockSpec((CG, L), lambda i: (i, 0)),
            pl.BlockSpec((CG, 1), lambda i: (i, 0)),
            pl.BlockSpec((CG, 1), lambda i: (i, 0)),
        ],
        out_specs=pl.BlockSpec((CG, L), lambda i: (i, 0)),
        compiler_params=pltpu.CompilerParams(
            dimension_semantics=("parallel",),
        ),
    )(x2d, g2d, b2d)

    out2d = out2d[:C]
    if N == 1:
        return out2d.reshape(N, C, H, W)
    return jnp.transpose(out2d.reshape(C, N, H, W), (1, 0, 2, 3))


if __name__ == "__main__":
    # Shapes implied by the module: x70 ~ [1, 24, 56, 56], BatchNorm2d(24)
    N, C, H, W = 1, 24, 56, 56
    key = jax.random.PRNGKey(0)
    kx, _, _ = jax.random.split(key, 3)
    x = jax.random.normal(kx, (N, C, H, W), dtype=jnp.float32)

    # Deterministic affine parameters (PyTorch default init is gamma=1, beta=0;
    # non-trivial deterministic values exercise the affine path).
    gamma = 1.0 + 0.1 * jnp.arange(C, dtype=jnp.float32)
    beta = 0.01 * jnp.arange(C, dtype=jnp.float32)
    # TODO(synk): running_mean/running_var momentum update (track_running_stats)
    # is training-state bookkeeping and does not affect the forward output here.

    out = batchnorm2d_pallas(x, gamma, beta)
    out = jax.block_until_ready(out)

    # sanity check vs. pure-JAX reference (training-mode batch-norm semantics)
    mean = jnp.mean(x, axis=(0, 2, 3), keepdims=True)
    var = jnp.mean((x - mean) ** 2, axis=(0, 2, 3), keepdims=True)
    ref = (x - mean) / jnp.sqrt(var + EPS) * gamma.reshape(1, C, 1, 1) + beta.reshape(1, C, 1, 1)
    assert out.shape == (N, C, H, W)
    assert jnp.max(jnp.abs(out - ref)) < 1e-4

    print("KERNEL_OK")
</pallas_src>

<mosaic_0001>
module attributes {stable_mosaic.version = 11 : i64} {
  func.func @_bn_kernel(%arg0: i32, %arg1: memref<8x3136xf32, #tpu.memory_space<vmem>>, %arg2: memref<8x1xf32, #tpu.memory_space<vmem>>, %arg3: memref<8x1xf32, #tpu.memory_space<vmem>>, %arg4: memref<8x3136xf32, #tpu.memory_space<vmem>>) attributes {dimension_semantics = [#tpu.dimension_semantics<parallel>], iteration_bounds = array<i64: 3>, scalar_prefetch = 0 : i64, scratch_operands = 0 : i64, tpu.core_type = #tpu.core_type<tc>, window_params = [{transform_indices = @transform_0, window_bounds = array<i64: 8, 3136>}, {transform_indices = @transform_1, window_bounds = array<i64: 8, 1>}, {transform_indices = @transform_2, window_bounds = array<i64: 8, 1>}, {transform_indices = @transform_3, window_bounds = array<i64: 8, 3136>}]} {
    %c0 = arith.constant 0 : index
    %c0_0 = arith.constant 0 : index
    %0 = vector.load %arg1[%c0, %c0_0] : memref<8x3136xf32, #tpu.memory_space<vmem>>, vector<8x3136xf32>
    %cst = arith.constant dense<0.000000e+00> : vector<8xf32>
    %1 = vector.multi_reduction <add>, %0, %cst [1] : vector<8x3136xf32> to vector<8xf32>
    %2 = vector.shape_cast %1 : vector<8xf32> to vector<8x1xf32>
    %3 = arith.mulf %0, %0 : vector<8x3136xf32>
    %cst_1 = arith.constant dense<0.000000e+00> : vector<8xf32>
    %4 = vector.multi_reduction <add>, %3, %cst_1 [1] : vector<8x3136xf32> to vector<8xf32>
    %5 = vector.shape_cast %4 : vector<8xf32> to vector<8x1xf32>
    %cst_2 = arith.constant 3.18877544E-4 : f32
    %6 = vector.broadcast %cst_2 : f32 to vector<8x1xf32>
    %7 = arith.mulf %2, %6 : vector<8x1xf32>
    %cst_3 = arith.constant 3.18877544E-4 : f32
    %8 = vector.broadcast %cst_3 : f32 to vector<8x1xf32>
    %9 = arith.mulf %5, %8 : vector<8x1xf32>
    %10 = arith.mulf %7, %7 : vector<8x1xf32>
    %11 = arith.subf %9, %10 : vector<8x1xf32>
    %c0_4 = arith.constant 0 : index
    %c0_5 = arith.constant 0 : index
    %12 = vector.load %arg2[%c0_4, %c0_5] : memref<8x1xf32, #tpu.memory_space<vmem>>, vector<8x1xf32>
    %cst_6 = arith.constant 9.99999974E-6 : f32
    %13 = vector.broadcast %cst_6 : f32 to vector<8x1xf32>
    %14 = arith.addf %11, %13 : vector<8x1xf32>
    %15 = math.rsqrt %14 : vector<8x1xf32>
    %16 = arith.mulf %12, %15 : vector<8x1xf32>
    %c0_7 = arith.constant 0 : index
    %c0_8 = arith.constant 0 : index
    %17 = vector.load %arg3[%c0_7, %c0_8] : memref<8x1xf32, #tpu.memory_space<vmem>>, vector<8x1xf32>
    %18 = arith.mulf %7, %16 : vector<8x1xf32>
    %19 = arith.subf %17, %18 : vector<8x1xf32>
    %20 = vector.broadcast %16 : vector<8x1xf32> to vector<8x3136xf32>
    %21 = arith.mulf %0, %20 : vector<8x3136xf32>
    %22 = vector.broadcast %19 : vector<8x1xf32> to vector<8x3136xf32>
    %23 = arith.addf %21, %22 : vector<8x3136xf32>
    %c0_9 = arith.constant 0 : index
    %c0_10 = arith.constant 0 : index
    %24 = vector.load %arg4[%c0_9, %c0_10] : memref<8x3136xf32, #tpu.memory_space<vmem>>, vector<8x3136xf32>
    tpu.vector_store %arg4[%c0_9, %c0_10], %23 {strides = array<i32>} : memref<8x3136xf32, #tpu.memory_space<vmem>>, vector<8x3136xf32>,
    return
  }
  func.func @transform_0(%arg0: i32) -> (i32, i32) {
    %c0_i32 = arith.constant 0 : i32
    %c0_i32_0 = arith.constant 0 : i32
    return %arg0, %c0_i32 : i32, i32
  }
  func.func @transform_1(%arg0: i32) -> (i32, i32) {
    %c0_i32 = arith.constant 0 : i32
    %c0_i32_0 = arith.constant 0 : i32
    return %arg0, %c0_i32 : i32, i32
  }
  func.func @transform_2(%arg0: i32) -> (i32, i32) {
    %c0_i32 = arith.constant 0 : i32
    %c0_i32_0 = arith.constant 0 : i32
    return %arg0, %c0_i32 : i32, i32
  }
  func.func @transform_3(%arg0: i32) -> (i32, i32) {
    %c0_i32 = arith.constant 0 : i32
    %c0_i32_0 = arith.constant 0 : i32
    return %arg0, %c0_i32 : i32, i32
  }
}

</mosaic_0001>

<bundles_post_ra>
// kernel: tpu_custom_call.1
= control target key start
LH: loop header
LB: loop body
LE: loop exit
PB: predicated region body
PF: predicated region fallthrough
CT: control target
= control target key end

     0   :  { %8 = vsyncpa [#allocation3], 0  ;;  %s1092_s0 = inlined_call_operand.hbm [shape: f32[24,3136], index: 0, kind: input, shape index: {}]   ;;  %s1093_s1 = inlined_call_operand.vmem [shape: f32[24,1], index: 1, kind: input, shape index: {}]   ;;  %s1094_s2 = inlined_call_operand.vmem [shape: f32[24,1], index: 2, kind: input, shape index: {}]   ;;  %s1095_s3 = inlined_call_operand.hbm [shape: f32[24,3136], index: 3, kind: output, shape index: {}]  }
   0x1   :  { %10 = vsyncpa [#allocation3 + $0x1], 0 }
   0x2   :  { %11 = vsyncpa [#allocation4], 0 }
   0x3   :  { %13 = vsyncpa [#allocation4 + $0x1], 0  ;;  %s717_s12 = smov 0   ;;  %s719_s13 = smov 0  }
   0x4   :  { %s721_s14 = smov 0   ;;  %s723_s15 = smov 0  }
   0x5 LB: > { %s738_s16 = sadd.s32 4294967295, %s692_s15   ;;  %s531_s17 = sadd.s32 4294967294, %s692_s15   ;;  %s692_s15 = sphi %s723_s15, %s1108_s15   ;;  %s688_s14 = sphi %s721_s14, %s1107_s14   ;;  %s684_s13 = sphi %s719_s13, %s1106_s13   ;;  %s680_s12 = sphi %s717_s12, %s1105_s12  }
   0x6   : > { %s742_s18 = sadd.s32 1, %s692_s15   ;;  %s26_s19 = sadd.s32 1, %s688_s14 }
   0x7   : > { %s23_s20 = ssub.s32 %s692_s15, %s742_s18  ;;  %p33_p0 = scmp.ne.s32.totalorder %s688_s14, %s684_s13 }
   0x8   : > { %p24_p1 = scmp.eq.s32.totalorder %s23_s20, 0  ;;  %p34_p2 = scmp.eq.s32.totalorder %s692_s15, 0 }
   0x9   : > { %p39_p3 = scmp.ne.s32.totalorder %s684_s13, %s680_s12  ;;  %p40_p4 = scmp.eq.s32.totalorder %s738_s16, 0 }
   0xa   : > { %s754_s21 = scalar_select %p24_p1, %s688_s14, %s26_s19  }
   0xb   : > { %p35_p5 = por %p34_p2, %p33_p0  ;;  %p756_p6 = por %p40_p4, %p39_p3 }
   0xc   : > { %p115_p7 = scmp.eq.s32.totalorder %s738_s16, 2  ;;  %p121_p8 = scmp.eq.s32.totalorder %s531_s17, 2 }
   0xd   : > { %p557_p9 = scmp.lt.s32.totalorder %s692_s15, 3  ;;  %s141_s25 = sand.u32 1, %s688_s14  }
   0xe   : > { %p762_p10 = por %p115_p7, %p33_p0  ;;  %p766_p11 = por %p121_p8, %p39_p3 }
   0xf   : > { %s542_s26 = smul.u32 3200, %s692_s15  ;;  %p777_p12 = pnand %p557_p9, %p35_p5 }
  0x10   : > { %s1098_s23 = scalar_select %p762_p10, 1, 0 }
  0x11   : > { %s1099_s24 = scalar_select %p766_p11, 1, 0 }
  0x12   : > { %s541_s27 = smul.u32 200, %s141_s25  ;;  %s775_s30 = scalar_lea.hbm %s1092_s0, %s542_s26 }
  0x13   : > { %s142_s7 = scalar_lea.sflag [#allocation3], %s141_s25  ;;  %s596_s8 = scalar_lea.hbm %s775_s30, 3200 }
  0x14   : > { %s145_s5 = scalar_lea.vmem [#allocation2], %s541_s27  ;;  %p597_p1 = scmp.ne.s32.totalorder %s775_s30, %s596_s8 }
  0x15   : > { %s153_s6 = sshll.u32 %s145_s5, 4  ;;  %p598_p2 = pneg %p777_p12  ;;  %s782_s6 = int_to_ptr.vmem [resolvable:$true] %s153_s6 }
  0x16   : > { %s601_s11 = scalar_lea.hbm %s1092_s0, 9600  ;;  %p602_p5 = scmp.lt.u32.totalorder %s775_s30, %s1092_s0 }
  0x17   : > { %p599_p3 = pnand %p598_p2, %p597_p1  ;;  %p603_p7 = scmp.lt.u32.totalorder %s601_s11, %s596_s8 }
  0x18   : > { %p605_p9 = scmp.lt.u32.totalorder %s596_s8, %s775_s30 }
  0x19   : > { %p600_p4 = pneg %p599_p3  ;;  %p604_p8 = por %p603_p7, %p602_p5 }
  0x1b   : > { %p606_p13 = por %p605_p9, %p604_p8 }
  0x1d   : > { %p607_p0 = pnand %p606_p13, %p600_p4 }
  0x1f   : > { %610 = shalt.err (!%p607_p0)
}
  0x20   : > { %s611_s20 = scalar_lea.vmem %s782_s6, 3200  ;;  %s694_s25 = smov [#allocation2]  }
  0x21   : > { %p612_p1 = scmp.ne.s32.totalorder %s782_s6, %s611_s20  ;;  %s616_s26 = sshll.u32 %s694_s25, 4  ;;  %s617_s26 = int_to_ptr.vmem [resolvable:$false] %s616_s26 }
  0x22   : > { %s618_s27 = scalar_lea.vmem %s617_s26, 6400  ;;  %p619_p10 = scmp.lt.s32.totalorder %s782_s6, %s617_s26 }
  0x23   : > { %p614_p3 = pnand %p612_p1, %p598_p2  ;;  %p620_p5 = scmp.lt.s32.totalorder %s618_s27, %s611_s20 }
  0x25   : > { %p615_p11 = pneg %p614_p3  ;;  %p621_p7 = por %p620_p5, %p619_p10 }
  0x27   : > { %p622_p8 = pnand %p621_p7, %p615_p11 }
  0x29   : > { %625 = shalt.err (!%p622_p8)
}
  0x2a   : > { %552 = dma.hbm_to_vmem [thread:$0]  (!%p777_p12), %s775_s30, 3200, %s782_s6, %s142_s7  }
  0x2b   : > { %p1101_p13 = scmp.lt.s32.totalorder %s692_s15, 4  ;;  %p1102_p0 = scmp.ge.s32.totalorder %s692_s15, 1 }
  0x2d   : > { %p173_p2 = pnand %p1102_p0, %p1101_p13 }
  0x2e   : > { %s815_s28 = sand.u32 (!%p173_p2), 1, %s684_s13  }
  0x2f   : > { %176 = sbr.rel (%p173_p2) target bundleno = 431 (0x1af), region = 32  ;;  %s179_s5 = scalar_lea.sflag (!%p173_p2), [#allocation3], %s815_s28 }
  0x30   : > { %s543_s29 = smul.u32 (!%p173_p2), 200, %s815_s28 }
  0x32   : > { %s821_s4 = scalar_lea.vmem (!%p173_p2), [#allocation2], %s543_s29 }
  0x36   : > { %671 = dma.done.wait (%p756_p6), %s179_s5, 3200  }
  0x37   : > { %673 = vsyncadd (%p756_p6), %s179_s5, 4294964096  ;;  %v828_v0 = vld [vmem:[%s821_s4] sm:$0xff]  ;;  %v831_v1 = vld [vmem:[%s821_s4 + $0x8] sm:$0xff]  ;;  %vm269_vm0 = vcmask 523264   ;;  %p213_p6 = scmp.lt.s32.totalorder %s738_s16, 2  ;;  %s1014_s17 = scalar_lea.vmem [#allocation5], %s543_s29 }
  0x38   : > { %v834_v2 = vld [vmem:[%s821_s4 + $0x10] sm:$0xff]  ;;  %v246_v3 = vadd.f32 %v831_v1, %v828_v0  ;;  %v274_v4 = vmul.f32 %v828_v0, %v828_v0  ;;  %v275_v5 = vmul.f32 %v831_v1, %v831_v1  ;;  %v843_v6 = vld [vmem:[%s821_s4 + $0x18] sm:$0xff]  ;;  %v849_v9 = vld [vmem:[%s821_s4 + $0x20] sm:$0xff]  ;;  %s544_s19 = smul.u32 3200, %s738_s16  ;;  %s437_s20 = sshll.u32 %s1014_s17, 4  ;;  %s1044_s20 = int_to_ptr.vmem [resolvable:$true] %s437_s20 }
  0x39   : > { %v276_v7 = vmul.f32 %v834_v2, %v834_v2  ;;  %v277_v10 = vmul.f32 %v843_v6, %v843_v6  ;;  %v855_v13 = vld [vmem:[%s821_s4 + $0x28] sm:$0xff]  ;;  %v278_v14 = vmul.f32 %v849_v9, %v849_v9  ;;  %v861_v17 = vld [vmem:[%s821_s4 + $0x30] sm:$0xff]  ;;  %v867_v21 = vld [vmem:[%s821_s4 + $0x38] sm:$0xff]  ;;  %s214_s22 = scalar_select %p213_p6, %s738_s16, 2 }
  0x3a   : > { %v247_v8 = vadd.f32 %v246_v3, %v834_v2  ;;  %v299_v11 = vadd.f32 %v275_v5, %v274_v4  ;;  %v279_v18 = vmul.f32 %v855_v13, %v855_v13  ;;  %v280_v22 = vmul.f32 %v861_v17, %v861_v17  ;;  %v873_v25 = vld [vmem:[%s821_s4 + $0x40] sm:$0xff]  ;;  %v879_v29 = vld [vmem:[%s821_s4 + $0x48] sm:$0xff]  ;;  %v885_v33 = vld [vmem:[%s821_s4 + $0x50] sm:$0xff]  ;;  %s1042_s27 = scalar_lea.hbm %s1095_s3, %s544_s19  ;;  %s423_s29 = scalar_lea.sflag [#allocation4], %s815_s28 }
  0x3b   : > { %v281_v26 = vmul.f32 %v867_v21, %v867_v21  ;;  %v282_v30 = vmul.f32 %v873_v25, %v873_v25  ;;  %v283_v34 = vmul.f32 %v879_v29, %v879_v29  ;;  %v891_v37 = vld [vmem:[%s821_s4 + $0x58] sm:$0xff]  ;;  %v284_v38 = vmul.f32 %v885_v33, %v885_v33  ;;  %v897_v41 = vld [vmem:[%s821_s4 + $0x60] sm:$0xff]  ;;  %v903_v45 = vld [vmem:[%s821_s4 + $0x68] sm:$0xff]  ;;  %s536_s30 = sshll.u32 %s214_s22, 3  ;;  %s626_s5 = scalar_lea.vmem %s1044_s20, 3200 }
  0x3c   : > { %v248_v12 = vadd.f32 %v247_v8, %v843_v6  ;;  %v300_v15 = vadd.f32 %v299_v11, %v276_v7  ;;  %v285_v42 = vmul.f32 %v891_v37, %v891_v37  ;;  %v286_v46 = vmul.f32 %v897_v41, %v897_v41  ;;  %v909_v49 = vld [vmem:[%s821_s4 + $0x70] sm:$0xff]  ;;  %v915_v53 = vld [vmem:[%s821_s4 + $0x78] sm:$0xff]  ;;  %v921_v57 = vld [vmem:[%s821_s4 + $0x80] sm:$0xff]  ;;  %s216_s8 = scalar_lea.vmem %s1093_s1, %s536_s30  ;;  %s220_s11 = scalar_lea.vmem %s1094_s2, %s536_s30 }
  0x3d   : > { %v287_v50 = vmul.f32 %v903_v45, %v903_v45  ;;  %v288_v54 = vmul.f32 %v909_v49, %v909_v49  ;;  %v289_v58 = vmul.f32 %v915_v53, %v915_v53  ;;  %v927_v61 = vld [vmem:[%s821_s4 + $0x88] sm:$0xff]  ;;  %v290_v62 = vmul.f32 %v921_v57, %v921_v57  ;;  %v933_v4 = vld [vmem:[%s821_s4 + $0x90] sm:$0xff]  ;;  %p627_p10 = scmp.ne.s32.totalorder %s1044_s20, %s626_s5  ;;  %p1103_p11 = scmp.ne.s32.totalorder %s1098_s23, 0 }
  0x3e   : > { %v249_v16 = vadd.f32 %v248_v12, %v849_v9  ;;  %v301_v19 = vadd.f32 %v300_v15, %v277_v10  ;;  %v291_v5 = vmul.f32 %v927_v61, %v927_v61  ;;  %v939_v10 = vld [vmem:[%s821_s4 + $0x98] sm:$0xff]  ;;  %v292_v11 = vmul.f32 %v933_v4, %v933_v4  ;;  %v945_v15 = vld [vmem:[%s821_s4 + $0xa0] sm:$0xff]  ;;  %s696_s16 = smov [#allocation5]  }
  0x3f   : > { %p628_p12 = pnand %p627_p10, %p1103_p11 }
  0x40   : > { %v250_v20 = vadd.f32 %v249_v16, %v855_v13  ;;  %v302_v23 = vadd.f32 %v301_v19, %v278_v14  ;;  %v293_v16 = vmul.f32 %v939_v10, %v939_v10 }
  0x41   : > { %p629_p4 = pneg %p628_p12 }
  0x42   : > { %v251_v24 = vadd.f32 %v250_v20, %v861_v17  ;;  %v303_v27 = vadd.f32 %v302_v23, %v279_v18  ;;  %v951_v20 = vld [vmem:[%s821_s4 + $0xa8] sm:$0xff] }
  0x44   : > { %v252_v28 = vadd.f32 %v251_v24, %v867_v21  ;;  %v304_v31 = vadd.f32 %v303_v27, %v280_v22  ;;  %v294_v22 = vmul.f32 %v945_v15, %v945_v15  ;;  %v295_v27 = vmul.f32 %v951_v20, %v951_v20 }
  0x46   : > { %v253_v32 = vadd.f32 %v252_v28, %v873_v25  ;;  %v305_v35 = vadd.f32 %v304_v31, %v281_v26  ;;  %v957_v26 = vld [vmem:[%s821_s4 + $0xb0] sm:$0xff] }
  0x48   : > { %v254_v36 = vadd.f32 %v253_v32, %v879_v29  ;;  %v306_v39 = vadd.f32 %v305_v35, %v282_v30  ;;  %v962_v30 = vld [vmem:[%s821_s4 + $0xc0] sm:$0xff]  ;;  %v966_v32 = vld [vmem:[%s821_s4 + $0xb8] sm:$0xff]  ;;  %s630_s4 = sshll.u32 %s696_s16, 4  ;;  %s631_s4 = int_to_ptr.vmem [resolvable:$false] %s630_s4 }
  0x49   : > { %s632_s22 = scalar_lea.vmem %s631_s4, 6400  ;;  %p633_p9 = scmp.lt.s32.totalorder %s1044_s20, %s631_s4 }
  0x4a   : > { %v255_v40 = vadd.f32 %v254_v36, %v885_v33  ;;  %v307_v43 = vadd.f32 %v306_v39, %v283_v34  ;;  %v296_v34 = vmul.f32 %v957_v26, %v957_v26  ;;  %v270_v39 = vsel %vm269_vm0, %v962_v30, 0.0  ;;  %p634_p1 = scmp.lt.s32.totalorder %s632_s22, %s626_s5 }
  0x4c   : > { %v256_v44 = vadd.f32 %v255_v40, %v891_v37  ;;  %v308_v47 = vadd.f32 %v307_v43, %v284_v38  ;;  %v298_v38 = vmul.f32 %v962_v30, %v962_v30  ;;  %v297_v40 = vmul.f32 %v966_v32, %v966_v32  ;;  %p635_p3 = por %p634_p1, %p633_p9 }
  0x4e   : > { %v257_v48 = vadd.f32 %v256_v44, %v897_v41  ;;  %v309_v51 = vadd.f32 %v308_v47, %v285_v42  ;;  %v322_v47 = vsel %vm269_vm0, %v298_v38, 0.0  ;;  %p636_p5 = pnand %p635_p3, %p629_p4 }
  0x50   : > { %v258_v52 = vadd.f32 %v257_v48, %v903_v45  ;;  %v310_v55 = vadd.f32 %v309_v51, %v286_v46  ;;  %v695_v51 = vmov 0  }
  0x51   : > { %592 = vset.pattern.permute.xlu1 %v695_v51  ;;  %593 = vset.pattern.permute.xlu0 %v695_v51 }
  0x52   : > { %v259_v56 = vadd.f32 %v258_v52, %v909_v49  ;;  %v311_v59 = vadd.f32 %v310_v55, %v287_v50 }
  0x54   : > { %v260_v60 = vadd.f32 %v259_v56, %v915_v53  ;;  %v312_v63 = vadd.f32 %v311_v59, %v288_v54 }
  0x56   : > { %v261_v3 = vadd.f32 %v260_v60, %v921_v57  ;;  %v313_v7 = vadd.f32 %v312_v63, %v289_v58 }
  0x58   : > { %v262_v8 = vadd.f32 %v261_v3, %v927_v61  ;;  %v314_v12 = vadd.f32 %v313_v7, %v290_v62  ;;  %v330_v62 = vld [vmem:[%s216_s8] sm:$0xff] }
  0x5a   : > { %v263_v14 = vadd.f32 %v262_v8, %v933_v4  ;;  %v315_v18 = vadd.f32 %v314_v12, %v291_v5  ;;  %v334_v5 = vld [vmem:[%s220_s11] sm:$0xff] }
  0x5c   : > { %v264_v19 = vadd.f32 %v263_v14, %v939_v10  ;;  %v316_v23 = vadd.f32 %v315_v18, %v292_v11 }
  0x5e   : > { %v265_v24 = vadd.f32 %v264_v19, %v945_v15  ;;  %v317_v28 = vadd.f32 %v316_v23, %v293_v16 }
  0x60   : > { %v266_v31 = vadd.f32 %v265_v24, %v951_v20  ;;  %v318_v35 = vadd.f32 %v317_v28, %v294_v22 }
  0x62   : > { %v267_v36 = vadd.f32 %v266_v31, %v957_v26  ;;  %v319_v42 = vadd.f32 %v318_v35, %v295_v27 }
  0x64   : > { %v268_v43 = vadd.f32 %v267_v36, %v966_v32  ;;  %v320_v44 = vadd.f32 %v319_v42, %v296_v34 }
  0x66   : > { %v271_v46 = vadd.f32 %v270_v39, %v268_v43  ;;  %v321_v48 = vadd.f32 %v320_v44, %v297_v40 }
  0x68   : > { %272 = vadd.xlane.f32.xlu0 %v271_v46  ;;  %v323_v50 = vadd.f32 %v322_v47, %v321_v48 }
  0x6c   : > { %324 = vadd.xlane.f32.xlu0 %v323_v50 }
  0xf5   : > { %v273_v52 = vpop.xlane.xlu0 %272 }
  0xf6   : > { %v326_v54 = vmul.f32 0.00031887754, %v273_v52 }
  0xf8   : > { %v328_v56 = vmul.f32 %v326_v54, %v326_v54 }
  0xf9   : > { %v325_v55 = vpop.xlane.xlu0 %324 }
  0xfa   : > { %v327_v58 = vmul.f32 0.00031887754, %v325_v55 }
  0xfc   : > { %v329_v59 = vsub.f32 %v327_v58, %v328_v56 }
  0xfe   : > { %v331_v60 = vadd.f32 1e-05, %v329_v59 }
 0x100   : > { %594 = vrsqrt.f32 %v331_v60 }
 0x10a   : > { %v595_v63 = vpop.eup %594 }
 0x10b   : > { %v333_v3 = vmul.f32 %v595_v63, %v330_v62 }
 0x10d   : > { %339 = vperm.xlu1 %592, %v333_v3   ;;  %v335_v7 = vmul.f32 %v333_v3, %v326_v54 }
 0x10f   : > { %v336_v8 = vsub.f32 %v334_v5, %v335_v7 }
 0x111   : > { %369 = vperm.xlu1 %592, %v336_v8  }
 0x18c   : > { %v340_v11 = vpop.permute.xlu1 %339 }
 0x18d   : > { %v342_v12 = vmul.f32 %v340_v11, %v828_v0  ;;  %v343_v14 = vmul.f32 %v340_v11, %v831_v1  ;;  %v344_v16 = vmul.f32 %v340_v11, %v834_v2  ;;  %v345_v18 = vmul.f32 %v340_v11, %v843_v6 }
 0x18e   : > { %v346_v19 = vmul.f32 %v340_v11, %v849_v9  ;;  %v347_v22 = vmul.f32 %v340_v11, %v855_v13  ;;  %v348_v23 = vmul.f32 %v340_v11, %v861_v17  ;;  %v349_v24 = vmul.f32 %v340_v11, %v867_v21 }
 0x18f   : > { %v350_v27 = vmul.f32 %v340_v11, %v873_v25  ;;  %v351_v28 = vmul.f32 %v340_v11, %v879_v29  ;;  %v352_v0 = vmul.f32 %v340_v11, %v885_v33  ;;  %v353_v1 = vmul.f32 %v340_v11, %v891_v37 }
 0x190   : > { %v354_v2 = vmul.f32 %v340_v11, %v897_v41  ;;  %v355_v6 = vmul.f32 %v340_v11, %v903_v45  ;;  %v356_v9 = vmul.f32 %v340_v11, %v909_v49  ;;  %v357_v13 = vmul.f32 %v340_v11, %v915_v53  ;;  %v370_v31 = vpop.permute.xlu1 %369 }
 0x191   : > { %v358_v17 = vmul.f32 %v340_v11, %v921_v57  ;;  %v359_v21 = vmul.f32 %v340_v11, %v927_v61  ;;  %v360_v25 = vmul.f32 %v340_v11, %v933_v4  ;;  %v361_v29 = vmul.f32 %v340_v11, %v939_v10 }
 0x192   : > { %v362_v33 = vmul.f32 %v340_v11, %v945_v15  ;;  %v363_v37 = vmul.f32 %v340_v11, %v951_v20  ;;  %v364_v41 = vmul.f32 %v340_v11, %v957_v26  ;;  %v365_v45 = vmul.f32 %v340_v11, %v966_v32 }
 0x193   : > { %v366_v49 = vmul.f32 %v340_v11, %v962_v30  ;;  %v372_v53 = vadd.f32 %v370_v31, %v342_v12  ;;  %v373_v57 = vadd.f32 %v370_v31, %v343_v14  ;;  %v374_v34 = vadd.f32 %v370_v31, %v344_v16 }
 0x194   : > { %v375_v61 = vadd.f32 %v370_v31, %v345_v18  ;;  %v376_v35 = vadd.f32 %v370_v31, %v346_v19  ;;  %v377_v4 = vadd.f32 %v370_v31, %v347_v22  ;;  %v378_v36 = vadd.f32 %v370_v31, %v348_v23 }
 0x195   : > { %v379_v10 = vadd.f32 %v370_v31, %v349_v24  ;;  %v380_v38 = vadd.f32 %v370_v31, %v350_v27  ;;  %v381_v15 = vadd.f32 %v370_v31, %v351_v28  ;;  %v382_v39 = vadd.f32 %v370_v31, %v352_v0  ;;  %397 = vst [vmem:[%s1014_s17] sm:$0xff] %v372_v53 }
 0x196   : > { %398 = vst [vmem:[%s1014_s17 + $0x8] sm:$0xff] %v373_v57  ;;  %399 = vst [vmem:[%s1014_s17 + $0x10] sm:$0xff] %v374_v34  ;;  %v383_v20 = vadd.f32 %v370_v31, %v353_v1  ;;  %v384_v26 = vadd.f32 %v370_v31, %v354_v2  ;;  %v385_v30 = vadd.f32 %v370_v31, %v355_v6 }
 0x197   : > { %v386_v32 = vadd.f32 %v370_v31, %v356_v9  ;;  %400 = vst [vmem:[%s1014_s17 + $0x18] sm:$0xff] %v375_v61  ;;  %401 = vst [vmem:[%s1014_s17 + $0x20] sm:$0xff] %v376_v35  ;;  %v387_v40 = vadd.f32 %v370_v31, %v357_v13  ;;  %v388_v42 = vadd.f32 %v370_v31, %v358_v17 }
 0x198   : > { %402 = vst [vmem:[%s1014_s17 + $0x28] sm:$0xff] %v377_v4  ;;  %403 = vst [vmem:[%s1014_s17 + $0x30] sm:$0xff] %v378_v36  ;;  %v389_v43 = vadd.f32 %v370_v31, %v359_v21  ;;  %v390_v44 = vadd.f32 %v370_v31, %v360_v25  ;;  %v391_v46 = vadd.f32 %v370_v31, %v361_v29 }
 0x199   : > { %404 = vst [vmem:[%s1014_s17 + $0x38] sm:$0xff] %v379_v10  ;;  %405 = vst [vmem:[%s1014_s17 + $0x40] sm:$0xff] %v380_v38  ;;  %v392_v47 = vadd.f32 %v370_v31, %v362_v33  ;;  %v393_v48 = vadd.f32 %v370_v31, %v363_v37  ;;  %v394_v50 = vadd.f32 %v370_v31, %v364_v41 }
 0x19a   : > { %406 = vst [vmem:[%s1014_s17 + $0x48] sm:$0xff] %v381_v15  ;;  %407 = vst [vmem:[%s1014_s17 + $0x50] sm:$0xff] %v382_v39  ;;  %v395_v51 = vadd.f32 %v370_v31, %v365_v45  ;;  %v396_v52 = vadd.f32 %v370_v31, %v366_v49 }
 0x19b   : > { %408 = vst [vmem:[%s1014_s17 + $0x58] sm:$0xff] %v383_v20  ;;  %409 = vst [vmem:[%s1014_s17 + $0x60] sm:$0xff] %v384_v26 }
 0x19c   : > { %410 = vst [vmem:[%s1014_s17 + $0x68] sm:$0xff] %v385_v30  ;;  %411 = vst [vmem:[%s1014_s17 + $0x70] sm:$0xff] %v386_v32 }
 0x19d   : > { %412 = vst [vmem:[%s1014_s17 + $0x78] sm:$0xff] %v387_v40  ;;  %413 = vst [vmem:[%s1014_s17 + $0x80] sm:$0xff] %v388_v42 }
 0x19e   : > { %414 = vst [vmem:[%s1014_s17 + $0x88] sm:$0xff] %v389_v43  ;;  %415 = vst [vmem:[%s1014_s17 + $0x90] sm:$0xff] %v390_v44 }
 0x19f   : > { %416 = vst [vmem:[%s1014_s17 + $0x98] sm:$0xff] %v391_v46  ;;  %417 = vst [vmem:[%s1014_s17 + $0xa0] sm:$0xff] %v392_v47 }
 0x1a0   : > { %418 = vst [vmem:[%s1014_s17 + $0xa8] sm:$0xff] %v393_v48  ;;  %419 = vst [vmem:[%s1014_s17 + $0xb0] sm:$0xff] %v394_v50 }
 0x1a1   : > { %420 = vst [vmem:[%s1014_s17 + $0xb8] sm:$0xff] %v395_v51  ;;  %421 = vst.msk [vmem:[%s1014_s17 + $0xc0] sm:$0xff] %vm269_vm0, %v396_v52 }
 0x1a2   : > { %639 = shalt.err (!%p636_p5)
}
 0x1a3   : > { %s640_s28 = scalar_lea.hbm %s1042_s27, 3200  ;;  %s644_s7 = scalar_lea.hbm %s1095_s3, 9600 }
 0x1a4   : > { %p641_p7 = scmp.ne.s32.totalorder %s1042_s27, %s640_s28  ;;  %p645_p0 = scmp.lt.u32.totalorder %s1042_s27, %s1095_s3 }
 0x1a5   : > { %p646_p2 = scmp.lt.u32.totalorder %s644_s7, %s640_s28  ;;  %p648_p10 = scmp.lt.u32.totalorder %s640_s28, %s1042_s27 }
 0x1a6   : > { %p642_p8 = pnand %p641_p7, %p1103_p11 }
 0x1a7   : > { %p647_p6 = por %p646_p2, %p645_p0 }
 0x1a8   : > { %p643_p13 = pneg %p642_p8 }
 0x1a9   : > { %p649_p12 = por %p648_p10, %p647_p6 }
 0x1ab   : > { %p650_p4 = pnand %p649_p12, %p643_p13 }
 0x1ad   : > { %653 = shalt.err (!%p650_p4)
}
 0x1ae   : > { %547 = dma.vmem_to_hbm [thread:$0]  (%p1103_p11), %s1044_s20, 3200, %s1042_s27, %s423_s29  }
 0x1af PF: > { %p558_p9 = scmp.ge.s32.totalorder %s692_s15, 2  ;;  %s449_s10 = sand.u32 1, %s680_s12  }
 0x1b0   : > { %p1104_p1 = scmp.ne.s32.totalorder %s1099_s24, 0  ;;  %s450_s11 = scalar_lea.sflag [#allocation4], %s449_s10 }
 0x1b2   : > { %p554_p3 = pnand %p558_p9, %p1104_p1 }
 0x1b4   : > { %675 = dma.done.wait (!%p554_p3), %s450_s11, 3200  }
 0x1b5   : > { %677 = vsyncadd (!%p554_p3), %s450_s11, 4294964096  ;;  %p16_p5 = scmp.ge.s32.totalorder %s742_s18, 5   ;;  %s1105_s12 = smov %s684_s13 }
 0x1b6   : > { %s1106_s13 = smov %s688_s14  ;;  %s1107_s14 = smov %s754_s21 }
 0x1b7   : > { %s1108_s15 = smov %s742_s18  ;;  %18 = sbr.rel (!%p16_p5) target bundleno = 5 (0x5), region = 83 }
 0x1be   :  { %455 = vsyncpa [#allocation3], 1 }
 0x1bf   :  { %457 = vsyncpa [#allocation3 + $0x1], 1 }
 0x1c0   :  { %458 = vsyncpa [#allocation4], 1 }
 0x1c1   :  { %460 = vsyncpa [#allocation4 + $0x1], 1 }

</bundles_post_ra>
